<compile_context>
chip_gen: v7x
topology: tpu7x:2x2x1
jax: 0.10.0
libtpu: 0.0.40
codegen_flags: <defaults>
</compile_context>

<pallas_src>
import functools

import jax
import jax.numpy as jnp
from jax.experimental import pallas as pl
from jax.experimental.pallas import tpu as pltpu


# ---------------------------------------------------------------------------- GELU

def _gelu_exact(x):
    # torch.nn.GELU(approximate='none'): 0.5 * x * (1 + erf(x / sqrt(2)))
    return 0.5 * x * (1.0 + jax.lax.erf(x * 0.7071067811865476))


def _gelu_tanh(x):
    # tanh approximation (single EUP tanh, frees VALU slots); use only when parity allows.
    c = 0.7978845608028654  # sqrt(2/pi)
    return 0.5 * x * (1.0 + jnp.tanh(c * (x + 0.044715 * x * x * x)))


# ---------------------------------------------------------------------------- kernels

def _ffn_kernel_resident(x_ref, w1_ref, b1_ref, w2_ref, b2_ref, o_ref, *, gelu_fn):
    # Weights fully resident in VMEM; one token tile per grid step.
    x = x_ref[...].astype(w1_ref.dtype)          # in-kernel cast: VPU work hidden under MXU
    h = jnp.dot(x, w1_ref[...], preferred_element_type=jnp.float32)
    g = gelu_fn(h + b1_ref[...].astype(jnp.float32))
    out = jnp.dot(g.astype(w2_ref.dtype), w2_ref[...], preferred_element_type=jnp.float32)
    o_ref[...] = (out + b2_ref[...].astype(jnp.float32)).astype(o_ref.dtype)


def _ffn_kernel_streamed(x_ref, w1_ref, b1_ref, w2_ref, b2_ref, o_ref, acc_ref, *, gelu_fn):
    # Hidden dimension streamed on the inner ("arbitrary") grid axis; f32 VMEM accumulator.
    h_idx = pl.program_id(1)

    @pl.when(h_idx == 0)
    def _init():
        acc_ref[...] = jnp.zeros_like(acc_ref)

    x = x_ref[...].astype(w1_ref.dtype)
    h = jnp.dot(x, w1_ref[...], preferred_element_type=jnp.float32)
    g = gelu_fn(h + b1_ref[...].astype(jnp.float32))
    acc_ref[...] += jnp.dot(
        g.astype(w2_ref.dtype), w2_ref[...], preferred_element_type=jnp.float32
    )

    @pl.when(h_idx == pl.num_programs(1) - 1)
    def _finalize():
        o_ref[...] = (acc_ref[...] + b2_ref[...].astype(jnp.float32)).astype(o_ref.dtype)


# ---------------------------------------------------------------------------- tiling helpers

def _vmem_capacity_bytes():
    try:
        cap = int(pltpu.get_tpu_info().vmem_capacity_bytes)
        if cap > 0:
            return cap
    except Exception:
        pass
    return 64 << 20  # conservative fallback: safe on every generation (v7x: 64 MiB/TC)


def _pick_token_tile(n, tm):
    """Multiple of 16 (bf16 sublane packing), prefer multiples of 256 (MXU pass height),
    keep >= 2 blocks on the parallel token axis (megacore) when n is big enough."""
    n16 = pl.cdiv(n, 16) * 16
    tm = max(16, (min(tm, n16) // 16) * 16)
    if n16 >= 512 and pl.cdiv(n, tm) < 2:
        tm = max(256, (pl.cdiv(n16, 2) // 16) * 16)
    if tm >= 256:
        tm = (tm // 256) * 256
    return tm


def _pick_hidden_tile(hidden, th):
    """Hidden tile (streamed path): multiple of 128. Prefer an exact divisor >= 256 (no padding);
    otherwise keep the requested width and let the caller zero-pad hidden."""
    th = max(128, (min(th, hidden) // 128) * 128)
    for cand in range(th, 255, -128):
        if hidden % cand == 0:
            return cand
    return th


def _footprint(tm, dim, th, x_bytes, w_bytes, out_bytes):
    """Per-step VMEM bytes: double-buffered tiles + f32 intermediates/accumulator."""
    return (
        2 * tm * dim * x_bytes        # x tile
        + 2 * dim * th * w_bytes      # W1 chunk
        + 2 * th * 4                  # b1 chunk
        + 2 * th * dim * w_bytes      # W2 chunk
        + 2 * dim * 4                 # b2
        + 2 * tm * dim * out_bytes    # out tile
        + tm * th * 4                 # h / GELU intermediate (f32)
        + tm * dim * 4                # second-matmul accumulator / result (f32)
    )


# ---------------------------------------------------------------------------- wrapper

@functools.partial(jax.jit, static_argnames=("tm", "th", "approximate_gelu"))
def feedforward(x, w1, b1, w2, b2, *, tm=512, th=512, approximate_gelu=False):
    """FeedForward: Linear(dim->hidden) -> GELU -> Dropout(0) -> Linear(hidden->dim) -> Dropout(0).

    x: (B, S, dim). Weights stored as (in, out) = transpose of nn.Linear.weight.
    The MXU compute dtype is the *weight* dtype (store weights in bf16 for speed, f32 for strict
    parity); x tiles are cast inside the kernel, so there are no wrapper-side HBM round trips.
    """
    B, S, dim = x.shape
    hidden = w1.shape[1]
    n = B * S

    x_b = jnp.dtype(x.dtype).itemsize
    w_b = jnp.dtype(w1.dtype).itemsize
    o_b = x_b

    vmem_cap = _vmem_capacity_bytes()
    budget = vmem_cap - (12 << 20)          # headroom for compiler scratch / semaphores

    tm_eff = _pick_token_tile(n, tm)
    gelu_fn = _gelu_tanh if approximate_gelu else _gelu_exact

    x2d = x.reshape(n, dim)                 # reshape only: no dtype cast in the wrapper
    b1v = b1.reshape(1, -1)
    b2v = b2.reshape(1, -1)

    resident_need = _footprint(tm_eff, dim, hidden, x_b, w_b, o_b)
    if resident_need <= budget:
        # ---- Path A: weights resident in VMEM, DMA'd once for the whole kernel. ----
        need = resident_need
        grid = (pl.cdiv(n, tm_eff),)
        kernel = functools.partial(_ffn_kernel_resident, gelu_fn=gelu_fn)
        grid_spec = pltpu.PrefetchScalarGridSpec(
            num_scalar_prefetch=0,
            grid=grid,
            in_specs=[
                pl.BlockSpec((tm_eff, dim), lambda i: (i, 0)),   # x tile (token axis)
                pl.BlockSpec((dim, hidden), lambda i: (0, 0)),   # W1 (resident)
                pl.BlockSpec((1, hidden), lambda i: (0, 0)),     # b1 (resident)
                pl.BlockSpec((hidden, dim), lambda i: (0, 0)),   # W2 (resident)
                pl.BlockSpec((1, dim), lambda i: (0, 0)),        # b2 (resident)
            ],
            out_specs=pl.BlockSpec((tm_eff, dim), lambda i: (i, 0)),
            scratch_shapes=[],
        )
        dim_sem = ("parallel",)
        weight_stream_factor = 1
        w1p, b1p, w2p = w1, b1v, w2
    else:
        # ---- Path B: stream W1 columns / W2 rows over an inner "arbitrary" hidden axis. ----
        th_eff = _pick_hidden_tile(hidden, th)
        while _footprint(tm_eff, dim, th_eff, x_b, w_b, o_b) > budget:
            if th_eff > 256:
                th_eff -= 128
            elif tm_eff > 64:
                tm_eff = max(64, ((tm_eff // 2) // 16) * 16)
            else:
                break
        need = _footprint(tm_eff, dim, th_eff, x_b, w_b, o_b)

        hidden_p = pl.cdiv(hidden, th_eff) * th_eff
        w1p, b1p, w2p = w1, b1v, w2
        if hidden_p != hidden:
            # Zero-padded hidden columns contribute exactly zero (W2 pad rows are zero).
            # TODO(synk): pad once at parameter-init time instead of per call.
            pad = hidden_p - hidden
            w1p = jnp.pad(w1p, ((0, 0), (0, pad)))
            b1p = jnp.pad(b1p, ((0, 0), (0, pad)))
            w2p = jnp.pad(w2p, ((0, pad), (0, 0)))

        grid = (pl.cdiv(n, tm_eff), hidden_p // th_eff)
        kernel = functools.partial(_ffn_kernel_streamed, gelu_fn=gelu_fn)
        grid_spec = pltpu.PrefetchScalarGridSpec(
            num_scalar_prefetch=0,
            grid=grid,
            in_specs=[
                pl.BlockSpec((tm_eff, dim), lambda i, h: (i, 0)),   # x tile
                pl.BlockSpec((dim, th_eff), lambda i, h: (0, h)),   # W1 column chunk
                pl.BlockSpec((1, th_eff), lambda i, h: (0, h)),     # b1 chunk
                pl.BlockSpec((th_eff, dim), lambda i, h: (h, 0)),   # W2 row chunk
                pl.BlockSpec((1, dim), lambda i, h: (0, 0)),        # b2
            ],
            out_specs=pl.BlockSpec((tm_eff, dim), lambda i, h: (i, 0)),
            scratch_shapes=[pltpu.VMEM((tm_eff, dim), jnp.float32)],
        )
        dim_sem = ("parallel", "arbitrary")
        weight_stream_factor = grid[0]

    vmem_limit = int(min(max(need + (8 << 20), 32 << 20), vmem_cap - (4 << 20)))

    cost = pl.CostEstimate(
        flops=4 * n * dim * hidden,                     # two matmuls, 2 flops/MAC
        transcendentals=n * hidden,                     # erf / tanh
        bytes_accessed=(
            n * dim * x_b
            + weight_stream_factor * 2 * dim * hidden * w_b
            + (hidden + dim) * 4
            + n * dim * o_b
        ),
    )

    out = pl.pallas_call(
        kernel,
        out_shape=jax.ShapeDtypeStruct((n, dim), x.dtype),
        grid_spec=grid_spec,
        compiler_params=pltpu.CompilerParams(
            dimension_semantics=dim_sem,
            vmem_limit_bytes=vmem_limit,
        ),
        cost_estimate=cost,
    )(x2d, w1p, b1p, w2p, b2v)

    return out.reshape(B, S, dim)


# ---------------------------------------------------------------------------- params / demo

def init_params(key, dim, hidden_dim, dtype=jnp.float32):
    # Deterministic init mimicking nn.Linear's uniform(-1/sqrt(fan_in), 1/sqrt(fan_in)).
    k1, k2, k3, k4 = jax.random.split(key, 4)
    bound1 = 1.0 / jnp.sqrt(dim)
    bound2 = 1.0 / jnp.sqrt(hidden_dim)
    w1 = jax.random.uniform(k1, (dim, hidden_dim), dtype, -bound1, bound1)
    b1 = jax.random.uniform(k2, (1, hidden_dim), dtype, -bound1, bound1)
    w2 = jax.random.uniform(k3, (hidden_dim, dim), dtype, -bound2, bound2)
    b2 = jax.random.uniform(k4, (1, dim), dtype, -bound2, bound2)
    return w1, b1, w2, b2


if __name__ == "__main__":
    # Small but lane-dense shapes (dim/hidden multiples of 128).
    B, S, dim, hidden = 2, 8, 128, 256

    key = jax.random.PRNGKey(0)
    kx, kp = jax.random.split(key)
    x = jax.random.normal(kx, (B, S, dim), dtype=jnp.float32)
    w1, b1, w2, b2 = init_params(kp, dim, hidden)

    # Cache weights in the compute dtype ONCE (outside jit) — per perf review.
    w1_bf = w1.astype(jnp.bfloat16)
    w2_bf = w2.astype(jnp.bfloat16)

    # bf16-MXU / f32-accumulate path (compute dtype = weight dtype).
    y = jax.block_until_ready(feedforward(x, w1_bf, b1, w2_bf, b2))
    assert y.shape == (B, S, dim)

    # Reference with matching bf16 casts (f32 accumulation).
    x2d = x.reshape(-1, dim)
    xb = x2d.astype(jnp.bfloat16).astype(jnp.float32)
    w1b = w1_bf.astype(jnp.float32)
    w2b = w2_bf.astype(jnp.float32)
    g = _gelu_exact(xb @ w1b + b1)
    ref_bf16 = (g.astype(jnp.bfloat16).astype(jnp.float32) @ w2b + b2).reshape(B, S, dim)
    assert jnp.allclose(y, ref_bf16, atol=2e-2, rtol=2e-2), float(
        jnp.max(jnp.abs(y - ref_bf16))
    )

    # Exact-erf f32 path (f32 weights) for strict parity with torch.nn.GELU().
    y32 = jax.block_until_ready(feedforward(x, w1, b1, w2, b2))
    ref32 = (_gelu_exact(x2d @ w1 + b1) @ w2 + b2).reshape(B, S, dim)
    assert jnp.allclose(y32, ref32, atol=1e-2, rtol=1e-2), float(
        jnp.max(jnp.abs(y32 - ref32))
    )

    print("KERNEL_OK")
</pallas_src>

<mosaic_0001>
module attributes {stable_mosaic.version = 11 : i64} {
  func.func @_ffn_kernel_resident(%arg0: i32, %arg1: memref<16x128xf32, #tpu.memory_space<vmem>>, %arg2: memref<128x256xbf16, #tpu.memory_space<vmem>>, %arg3: memref<1x256xf32, #tpu.memory_space<vmem>>, %arg4: memref<256x128xbf16, #tpu.memory_space<vmem>>, %arg5: memref<1x128xf32, #tpu.memory_space<vmem>>, %arg6: memref<16x128xf32, #tpu.memory_space<vmem>>) attributes {dimension_semantics = [#tpu.dimension_semantics<parallel>], iteration_bounds = array<i64: 1>, scalar_prefetch = 0 : i64, scratch_operands = 0 : i64, tpu.core_type = #tpu.core_type<tc>, window_params = [{transform_indices = @transform_0, window_bounds = array<i64: 16, 128>}, {pipeline_mode = #tpu.pipeline_mode<synchronous>, transform_indices = @transform_1, window_bounds = array<i64: 128, 256>}, {pipeline_mode = #tpu.pipeline_mode<synchronous>, transform_indices = @transform_2, window_bounds = array<i64: 1, 256>}, {pipeline_mode = #tpu.pipeline_mode<synchronous>, transform_indices = @transform_3, window_bounds = array<i64: 256, 128>}, {pipeline_mode = #tpu.pipeline_mode<synchronous>, transform_indices = @transform_4, window_bounds = array<i64: 1, 128>}, {transform_indices = @transform_5, window_bounds = array<i64: 16, 128>}]} {
    %c0 = arith.constant 0 : index
    %c0_0 = arith.constant 0 : index
    %0 = vector.load %arg1[%c0, %c0_0] : memref<16x128xf32, #tpu.memory_space<vmem>>, vector<16x128xf32>
    %1 = arith.truncf %0 : vector<16x128xf32> to vector<16x128xbf16>
    %c0_1 = arith.constant 0 : index
    %c0_2 = arith.constant 0 : index
    %2 = vector.load %arg2[%c0_1, %c0_2] : memref<128x256xbf16, #tpu.memory_space<vmem>>, vector<128x256xbf16>
    %cst = arith.constant dense<0.000000e+00> : vector<16x256xf32>
    %3 = tpu.matmul %1, %2, %cst {dimension_numbers = #tpu.dot_dimension_numbers<[1], [0], [0], [1], [0, 0, 1, 1], [], []>} : vector<16x128xbf16>, vector<128x256xbf16>, vector<16x256xf32> -> vector<16x256xf32>
    %c0_3 = arith.constant 0 : index
    %c0_4 = arith.constant 0 : index
    %4 = vector.load %arg3[%c0_3, %c0_4] : memref<1x256xf32, #tpu.memory_space<vmem>>, vector<1x256xf32>
    %5 = vector.broadcast %4 : vector<1x256xf32> to vector<16x256xf32>
    %6 = arith.addf %3, %5 : vector<16x256xf32>
    %cst_5 = arith.constant 5.000000e-01 : f32
    %7 = vector.broadcast %cst_5 : f32 to vector<16x256xf32>
    %8 = arith.mulf %7, %6 : vector<16x256xf32>
    %cst_6 = arith.constant 0.707106769 : f32
    %9 = vector.broadcast %cst_6 : f32 to vector<16x256xf32>
    %10 = arith.mulf %6, %9 : vector<16x256xf32>
    %11 = math.erf %10 : vector<16x256xf32>
    %cst_7 = arith.constant 1.000000e+00 : f32
    %12 = vector.broadcast %cst_7 : f32 to vector<16x256xf32>
    %13 = arith.addf %12, %11 : vector<16x256xf32>
    %14 = arith.mulf %8, %13 : vector<16x256xf32>
    %15 = arith.truncf %14 : vector<16x256xf32> to vector<16x256xbf16>
    %c0_8 = arith.constant 0 : index
    %c0_9 = arith.constant 0 : index
    %16 = vector.load %arg4[%c0_8, %c0_9] : memref<256x128xbf16, #tpu.memory_space<vmem>>, vector<256x128xbf16>
    %cst_10 = arith.constant dense<0.000000e+00> : vector<16x128xf32>
    %17 = tpu.matmul %15, %16, %cst_10 {dimension_numbers = #tpu.dot_dimension_numbers<[1], [0], [0], [1], [0, 0, 1, 1], [], []>} : vector<16x256xbf16>, vector<256x128xbf16>, vector<16x128xf32> -> vector<16x128xf32>
    %c0_11 = arith.constant 0 : index
    %c0_12 = arith.constant 0 : index
    %18 = vector.load %arg5[%c0_11, %c0_12] : memref<1x128xf32, #tpu.memory_space<vmem>>, vector<1x128xf32>
    %19 = vector.broadcast %18 : vector<1x128xf32> to vector<16x128xf32>
    %20 = arith.addf %17, %19 : vector<16x128xf32>
    %c0_13 = arith.constant 0 : index
    %c0_14 = arith.constant 0 : index
    %21 = vector.load %arg6[%c0_13, %c0_14] : memref<16x128xf32, #tpu.memory_space<vmem>>, vector<16x128xf32>
    tpu.vector_store %arg6[%c0_13, %c0_14], %20 {strides = array<i32>} : memref<16x128xf32, #tpu.memory_space<vmem>>, vector<16x128xf32>,
    return
  }
  func.func @transform_0(%arg0: i32) -> (i32, i32) {
    %c0_i32 = arith.constant 0 : i32
    %c0_i32_0 = arith.constant 0 : i32
    return %arg0, %c0_i32 : i32, i32
  }
  func.func @transform_1(%arg0: i32) -> (i32, i32) {
    %c0_i32 = arith.constant 0 : i32
    %c0_i32_0 = arith.constant 0 : i32
    %c0_i32_1 = arith.constant 0 : i32
    return %c0_i32, %c0_i32_0 : i32, i32
  }
  func.func @transform_2(%arg0: i32) -> (i32, i32) {
    %c0_i32 = arith.constant 0 : i32
    %c0_i32_0 = arith.constant 0 : i32
    %c0_i32_1 = arith.constant 0 : i32
    return %c0_i32, %c0_i32_0 : i32, i32
  }
  func.func @transform_3(%arg0: i32) -> (i32, i32) {
    %c0_i32 = arith.constant 0 : i32
    %c0_i32_0 = arith.constant 0 : i32
    %c0_i32_1 = arith.constant 0 : i32
    return %c0_i32, %c0_i32_0 : i32, i32
  }
  func.func @transform_4(%arg0: i32) -> (i32, i32) {
    %c0_i32 = arith.constant 0 : i32
    %c0_i32_0 = arith.constant 0 : i32
    %c0_i32_1 = arith.constant 0 : i32
    return %c0_i32, %c0_i32_0 : i32, i32
  }
  func.func @transform_5(%arg0: i32) -> (i32, i32) {
    %c0_i32 = arith.constant 0 : i32
    %c0_i32_0 = arith.constant 0 : i32
    return %arg0, %c0_i32 : i32, i32
  }
}

</mosaic_0001>

<bundles_post_ra>
// kernel: feedforward.1
= control target key start
LH: loop header
LB: loop body
LE: loop exit
PB: predicated region body
PF: predicated region fallthrough
CT: control target
= control target key end

     0   :  { %10 = vsyncpa [#allocation3], 0  ;;  %s750_s0 = inlined_call_operand.hbm [shape: f32[16,128], index: 0, kind: input, shape index: {}]   ;;  %s751_s1 = inlined_call_operand.hbm [shape: bf16[128,256], index: 1, kind: input, shape index: {}]   ;;  %s752_s2 = inlined_call_operand.vmem [shape: f32[1,256], index: 2, kind: input, shape index: {}]   ;;  %s753_s3 = inlined_call_operand.hbm [shape: bf16[256,128], index: 3, kind: input, shape index: {}]   ;;  %s754_s4 = inlined_call_operand.vmem [shape: f32[1,128], index: 4, kind: input, shape index: {}]   ;;  %s755_s5 = inlined_call_operand.hbm [shape: f32[16,128], index: 5, kind: output, shape index: {}]  }
   0x1   :  { %11 = vsyncpa [#allocation6], 0 }
   0x2   :  { %12 = vsyncpa [#allocation4], 0  ;;  %s641_s18 = smov [#allocation5]   ;;  %s642_s20 = smov [#allocation2]  }
   0x3   :  { %s30_s19 = sshll.u32 %s641_s18, 4  ;;  %s18_s21 = sshll.u32 %s642_s20, 4  ;;  %s31_s19 = int_to_ptr.vmem [resolvable:$true] %s30_s19  ;;  %s680_s21 = int_to_ptr.vmem [resolvable:$true] %s18_s21 }
   0x4   :  { %s547_s24 = scalar_lea.hbm %s751_s1, 2048 }
   0x5   :  { %p548_p0 = scmp.ne.s32.totalorder %s751_s1, %s547_s24  ;;  %p551_p1 = scmp.lt.u32.totalorder %s547_s24, %s751_s1 }
   0x7   :  { %p553_p2 = pnand %p551_p1, %p548_p0 }
   0x9   :  { %556 = shalt.err (!%p553_p2)
}
   0xa   :  { %s557_s29 = scalar_lea.vmem %s31_s19, 2048  ;;  %p562_p4 = scmp.lt.s32.totalorder %s31_s19, %s31_s19 }
   0xb   :  { %p558_p3 = scmp.ne.s32.totalorder %s31_s19, %s557_s29  ;;  %p563_p5 = scmp.lt.s32.totalorder %s557_s29, %s557_s29 }
   0xd   :  { %p564_p6 = por %p563_p5, %p562_p4 }
   0xf   :  { %p565_p7 = pnand %p564_p6, %p558_p3 }
  0x11   :  { %568 = shalt.err (!%p565_p7)
}
  0x12   :  { %s643_s30 = smov 128   ;;  %s644_s6 = smov 8  }
  0x13   :  { %36 = dma.hbm_to_vmem [thread:$0]  %s751_s1, 2048, %s31_s19, [#allocation6], %s643_s30, %s643_s30, %s644_s6  }
  0x14   :  { %s569_s11 = scalar_lea.hbm %s750_s0, 256 }
  0x15   :  { %p570_p8 = scmp.ne.s32.totalorder %s750_s0, %s569_s11  ;;  %p573_p9 = scmp.lt.u32.totalorder %s569_s11, %s750_s0 }
  0x17   :  { %p575_p10 = pnand %p573_p9, %p570_p8 }
  0x19   :  { %578 = shalt.err (!%p575_p10)
}
  0x1a   :  { %s579_s16 = scalar_lea.vmem %s680_s21, 256  ;;  %p584_p12 = scmp.lt.s32.totalorder %s680_s21, %s680_s21 }
  0x1b   :  { %p580_p11 = scmp.ne.s32.totalorder %s680_s21, %s579_s16  ;;  %p585_p13 = scmp.lt.s32.totalorder %s579_s16, %s579_s16 }
  0x1d   :  { %p586_p0 = por %p585_p13, %p584_p12 }
  0x1f   :  { %p587_p1 = pnand %p586_p0, %p580_p11 }
  0x21   :  { %590 = shalt.err (!%p587_p1)
}
  0x22   :  { %24 = dma.hbm_to_vmem [thread:$0]  %s750_s0, 256, %s680_s21, [#allocation3], %s643_s30, %s643_s30, %s644_s6  }
  0x23   :  { %s645_s18 = smov [#allocation7]   ;;  %s591_s23 = scalar_lea.hbm %s753_s3, 2048 }
  0x24   :  { %s44_s19 = sshll.u32 %s645_s18, 4  ;;  %p592_p2 = scmp.ne.s32.totalorder %s753_s3, %s591_s23  ;;  %s45_s19 = int_to_ptr.vmem [resolvable:$true] %s44_s19 }
  0x25   :  { %p595_p3 = scmp.lt.u32.totalorder %s591_s23, %s753_s3 }
  0x27   :  { %p597_p4 = pnand %p595_p3, %p592_p2 }
  0x29   :  { %600 = shalt.err (!%p597_p4)
}
  0x2a   :  { %s601_s28 = scalar_lea.vmem %s45_s19, 2048  ;;  %p606_p6 = scmp.lt.s32.totalorder %s45_s19, %s45_s19 }
  0x2b   :  { %p602_p5 = scmp.ne.s32.totalorder %s45_s19, %s601_s28  ;;  %p607_p7 = scmp.lt.s32.totalorder %s601_s28, %s601_s28 }
  0x2d   :  { %p608_p8 = por %p607_p7, %p606_p6 }
  0x2f   :  { %p609_p9 = pnand %p608_p8, %p602_p5 }
  0x31   :  { %612 = shalt.err (!%p609_p9)
}
  0x32   :  { %s646_s0 = smov 64   ;;  %s647_s21 = smov 4  }
  0x33   :  { %50 = dma.hbm_to_vmem [thread:$0]  %s753_s3, 2048, %s45_s19, [#allocation6], %s646_s0, %s646_s0, %s647_s21  }
  0x34   :  { %635 = dma.done.wait [#allocation3], 256  }
  0x35   :  { %636 = vsyncadd [#allocation3], 4294967040 }
  0x36   :  { %637 = dma.done.wait [#allocation6], 4096  }
  0x37   :  { %638 = vsyncadd [#allocation6], 4294963200  ;;  %v648_v0 = vmov 0   ;;  %v499_v1 = vld [vmem:[#allocation5 + $0x4] ss:$8 sps:$4 sm:$0xff]   ;;  %v63_v21 = vld [vmem:[#allocation2] sm:$0xff]  ;;  %v84_v36 = vlaneseq }
  0x38   :  { %206 = vmatprep.mubr.bf16.mxu0 %v648_v0  ;;  %v501_v2 = vld [vmem:[#allocation5] ss:$8 sps:$4 sm:$0xff]   ;;  %174 = vmatprep.subr.bf16.mxu0 %v499_v1  ;;  %v502_v3 = vld [vmem:[#allocation5 + $0x14] ss:$8 sps:$4 sm:$0xff]   ;;  %v504_v4 = vld [vmem:[#allocation5 + $0x10] ss:$8 sps:$4 sm:$0xff]  }
  0x39   :  { %175 = vmatpush1.bf16.msra.mxu0 %v501_v2  ;;  %v505_v5 = vld [vmem:[#allocation5 + $0x24] ss:$8 sps:$4 sm:$0xff]   ;;  %v507_v6 = vld [vmem:[#allocation5 + $0x20] ss:$8 sps:$4 sm:$0xff]   ;;  %v508_v7 = vld [vmem:[#allocation5 + $0x34] ss:$8 sps:$4 sm:$0xff]  }
  0x3a   :  { %176 = vmatprep.subr.bf16.mxu0 %v502_v3  ;;  %v510_v8 = vld [vmem:[#allocation5 + $0x30] ss:$8 sps:$4 sm:$0xff]   ;;  %v511_v9 = vld [vmem:[#allocation5 + $0x44] ss:$8 sps:$4 sm:$0xff]   ;;  %v513_v11 = vld [vmem:[#allocation5 + $0x40] ss:$8 sps:$4 sm:$0xff]  }
  0x3b   :  { %v523_v10 = vld [vmem:[#allocation7 + $0x40] sm:$0xff]   ;;  %v525_v13 = vld [vmem:[#allocation7 + $0x48] sm:$0xff]   ;;  %v514_v14 = vld [vmem:[#allocation5 + $0x54] ss:$8 sps:$4 sm:$0xff]   ;;  %v85_v37 = vshrl.u32 %v84_v36, 7  ;;  %s649_s10 = smov [#allocation8]  }
  0x3c   :  { %v524_v12 = vld [vmem:[#allocation7] sm:$0xff]   ;;  %468 = vmatprep.subr.bf16.mxu1 %v523_v10  ;;  %v526_v15 = vld [vmem:[#allocation7 + $0x8] sm:$0xff]   ;;  %v516_v16 = vld [vmem:[#allocation5 + $0x50] ss:$8 sps:$4 sm:$0xff]   ;;  %s422_s11 = sshll.u32 %s649_s10, 4  ;;  %s423_s11 = int_to_ptr.vmem [resolvable:$true] %s422_s11 }
  0x3d   :  { %177 = vmatpush1.bf16.msra.mxu0 %v504_v4  ;;  %469 = vmatpush3.bf16.msra.mxu1 %v524_v12  ;;  %v517_v17 = vld [vmem:[#allocation5 + $0x64] ss:$8 sps:$4 sm:$0xff]   ;;  %v519_v18 = vld [vmem:[#allocation5 + $0x60] ss:$8 sps:$4 sm:$0xff]   ;;  %v520_v19 = vld [vmem:[#allocation5 + $0x74] ss:$8 sps:$4 sm:$0xff]   ;;  %p618_p11 = scmp.lt.s32.totalorder %s423_s11, %s423_s11 }
  0x3e   :  { %178 = vmatprep.subr.bf16.mxu0 %v505_v5  ;;  %470 = vmatprep.subr.bf16.mxu1 %v525_v13  ;;  %v522_v20 = vld [vmem:[#allocation5 + $0x70] ss:$8 sps:$4 sm:$0xff]   ;;  %v531_v28 = vld [vmem:[#allocation7 + $0x60] sm:$0xff]   ;;  %v533_v30 = vld [vmem:[#allocation7 + $0x68] sm:$0xff]   ;;  %v86_v38 = vsub.s32 0, %v85_v37  ;;  %v90_v40 = vsub.s32 1, %v85_v37 }
  0x3f   :  { %v64_v22 = vld [vmem:[#allocation2 + $0x8] sm:$0xff]  ;;  %v527_v24 = vld [vmem:[#allocation7 + $0x50] sm:$0xff]   ;;  %v532_v29 = vld [vmem:[#allocation7 + $0x20] sm:$0xff]   ;;  %s613_s12 = scalar_lea.vmem %s423_s11, 256 }
  0x40   :  { %v65_v23 = vpack.c.bf16 %v64_v22, %v63_v21  ;;  %v528_v25 = vld [vmem:[#allocation7 + $0x10] sm:$0xff]   ;;  %v529_v26 = vld [vmem:[#allocation7 + $0x58] sm:$0xff]   ;;  %v534_v31 = vld [vmem:[#allocation7 + $0x28] sm:$0xff]   ;;  %p614_p10 = scmp.ne.s32.totalorder %s423_s11, %s613_s12  ;;  %p619_p12 = scmp.lt.s32.totalorder %s613_s12, %s613_s12 }
  0x41   :  { %179 = vmatpush1.bf16.msra.mxu0 %v507_v6  ;;  %471 = vmatpush3.bf16.msra.mxu1 %v526_v15  ;;  %v530_v27 = vld [vmem:[#allocation7 + $0x18] sm:$0xff]   ;;  %v535_v32 = vld [vmem:[#allocation7 + $0x70] sm:$0xff]  }
  0x42   :  { %180 = vmatprep.subr.bf16.mxu0 %v508_v7  ;;  %472 = vmatprep.subr.bf16.mxu1 %v527_v24  ;;  %v536_v33 = vld [vmem:[#allocation7 + $0x30] sm:$0xff]   ;;  %v537_v34 = vld [vmem:[#allocation7 + $0x78] sm:$0xff]   ;;  %p620_p13 = por %p619_p12, %p618_p11 }
  0x43   :  { %v538_v35 = vld [vmem:[#allocation7 + $0x38] sm:$0xff]   ;;  %v82_v39 = vld [vmem:[%s752_s2] sm:$0x3] }
  0x44   :  { %v87_v41 = vrot.slane %v82_v39, %v86_v38  ;;  %v91_v42 = vrot.slane %v82_v39, %v90_v40  ;;  %v451_v10 = vld [vmem:[%s754_s4] ss:$0 sm:$0xff]  ;;  %p621_p0 = pnand %p620_p13, %p614_p10 }
  0x45   :  { %181 = vmatpush1.bf16.msra.mxu0 %v510_v8  ;;  %473 = vmatpush3.bf16.msra.mxu1 %v528_v25 }
  0x46   :  { %182 = vmatprep.subr.bf16.mxu0 %v511_v9  ;;  %474 = vmatprep.subr.bf16.mxu1 %v529_v26 }
  0x49   :  { %183 = vmatpush1.bf16.msra.mxu0 %v513_v11  ;;  %475 = vmatpush3.bf16.msra.mxu1 %v530_v27 }
  0x4a   :  { %184 = vmatprep.subr.bf16.mxu0 %v514_v14  ;;  %476 = vmatprep.subr.bf16.mxu1 %v531_v28 }
  0x4d   :  { %185 = vmatpush1.bf16.msra.mxu0 %v516_v16  ;;  %477 = vmatpush3.bf16.msra.mxu1 %v532_v29 }
  0x4e   :  { %186 = vmatprep.subr.bf16.mxu0 %v517_v17  ;;  %478 = vmatprep.subr.bf16.mxu1 %v533_v30 }
  0x51   :  { %187 = vmatpush1.bf16.msra.mxu0 %v519_v18  ;;  %479 = vmatpush3.bf16.msra.mxu1 %v534_v31 }
  0x52   :  { %188 = vmatprep.subr.bf16.mxu0 %v520_v19  ;;  %480 = vmatprep.subr.bf16.mxu1 %v535_v32 }
  0x55   :  { %189 = vmatpush1.bf16.msra.mxu0 %v522_v20  ;;  %481 = vmatpush3.bf16.msra.mxu1 %v536_v33 }
  0x56   :  { %482 = vmatprep.subr.bf16.mxu1 %v537_v34 }
  0x58   :  { %207 = vmatmul.mubr.bf16.vlgmr.msra.gmra.mrb[0].mxu0 %v65_v23 }
  0x59   :  { %483 = vmatpush3.bf16.msra.mxu1 %v538_v35 }
 0x12b   :  { %v208_v43 = vpop.f32.mrb[0].mxu0 }
 0x12c   :  { %v209_v44 = vadd.f32 %v208_v43, %v87_v41  ;;  %v210_v45 = vpop.f32.mrb[1].mxu0 }
 0x12d   :  { %v211_v46 = vadd.f32 %v210_v45, %v91_v42  ;;  %v212_v47 = vpop.f32.mrb[2].mxu0 }
 0x12e   :  { %v221_v48 = vmul.f32 0.70710677, %v209_v44  ;;  %v213_v49 = vadd.f32 %v212_v47, %v87_v41  ;;  %v214_v50 = vpop.f32.mrb[3].mxu0  ;;  %v217_v61 = vmul.f32 0.5, %v209_v44 }
 0x12f   :  { %v222_v51 = vmul.f32 0.70710677, %v211_v46  ;;  %v215_v52 = vadd.f32 %v214_v50, %v91_v42  ;;  %v218_v0 = vmul.f32 0.5, %v211_v46 }
 0x130   :  { %539 = verf.f32 %v221_v48  ;;  %v223_v53 = vmul.f32 0.70710677, %v213_v49  ;;  %v219_v62 = vmul.f32 0.5, %v213_v49 }
 0x131   :  { %541 = verf.f32 %v222_v51  ;;  %v224_v54 = vmul.f32 0.70710677, %v215_v52  ;;  %v220_v1 = vmul.f32 0.5, %v215_v52 }
 0x132   :  { %543 = verf.f32 %v223_v53 }
 0x133   :  { %545 = verf.f32 %v224_v54 }
 0x13a   :  { %v540_v55 = vpop.eup %539 }
 0x13b   :  { %v542_v56 = vpop.eup %541  ;;  %v229_v57 = vadd.f32 1.0, %v540_v55 }
 0x13c   :  { %v544_v58 = vpop.eup %543  ;;  %v230_v59 = vadd.f32 1.0, %v542_v56 }
 0x13d   :  { %v546_v60 = vpop.eup %545  ;;  %v231_v63 = vadd.f32 1.0, %v544_v58  ;;  %v233_v3 = vmul.f32 %v229_v57, %v217_v61 }
 0x13e   :  { %v232_v2 = vadd.f32 1.0, %v546_v60  ;;  %v234_v5 = vmul.f32 %v230_v59, %v218_v0 }
 0x13f   :  { %v235_v4 = vmul.f32 %v231_v63, %v219_v62 }
 0x140   :  { %v236_v6 = vmul.f32 %v232_v2, %v220_v1 }
 0x141   :  { %v237_v7 = vpack.c.bf16 %v235_v4, %v233_v3 }
 0x142   :  { %v238_v8 = vpack.c.bf16 %v236_v6, %v234_v5 }
 0x144   :  { %406 = vmatprep.mubr.bf16.mxu1 %v238_v8 }
 0x145   :  { %407 = vmatmul.mubr.bf16.vlgmr.msra.gmra.mrb[0].mxu1 %v237_v7 }
 0x218   :  { %v484_v9 = vpop.f32.mrb[0].mxu1 }
 0x219   :  { %v485_v11 = vpop.f32.mrb[1].mxu1 }
 0x21a   :  { %v486_v12 = vadd.f32 %v485_v11, %v484_v9  ;;  %v487_v13 = vpop.f32.mrb[2].mxu1 }
 0x21b   :  { %v488_v14 = vpop.f32.mrb[3].mxu1 }
 0x21c   :  { %v409_v15 = vadd.f32 %v486_v12, %v451_v10  ;;  %v489_v16 = vadd.f32 %v488_v14, %v487_v13 }
 0x21e   :  { %415 = vst [vmem:[#allocation8] sm:$0xff] %v409_v15  ;;  %v412_v17 = vadd.f32 %v489_v16, %v451_v10 }
 0x220   :  { %416 = vst [vmem:[#allocation8 + $0x8] sm:$0xff] %v412_v17 }
 0x221   :  { %624 = shalt.err (!%p621_p0)
}
 0x222   :  { %s625_s14 = scalar_lea.hbm %s755_s5, 256 }
 0x223   :  { %p626_p1 = scmp.ne.s32.totalorder %s755_s5, %s625_s14  ;;  %p629_p2 = scmp.lt.u32.totalorder %s625_s14, %s755_s5 }
 0x225   :  { %p631_p3 = pnand %p629_p2, %p626_p1 }
 0x227   :  { %634 = shalt.err (!%p631_p3)
}
 0x228   :  { %428 = dma.vmem_to_hbm [thread:$0]  %s423_s11, 256, %s755_s5, [#allocation4], %s643_s30, %s643_s30, %s644_s6  }
 0x229   :  { %639 = dma.done.wait [#allocation4], 256  }
 0x22a   :  { %640 = vsyncadd [#allocation4], 4294967040 }
 0x22b   :  { %432 = vsyncpa [#allocation3], 1 }
 0x22c   :  { %433 = vsyncpa [#allocation6], 1 }
 0x22d   :  { %434 = vsyncpa [#allocation4], 1 }

</bundles_post_ra>
